<compile_context>
chip_gen: v7x
topology: tpu7x:2x2x1
jax: 0.10.0
libtpu: 0.0.40
codegen_flags: <defaults>
</compile_context>

<pallas_src>
import numpy as np
import jax
import jax.numpy as jnp
from jax.experimental import pallas as pl
from jax.experimental.pallas import tpu as pltpu


# ----------------------------------------------------------------------------
# Host-side helpers (glue)
# ----------------------------------------------------------------------------
def bilinear_matrix(out_size, in_size):
    """[out,in] matrix reproducing F.interpolate(mode='bilinear',
    align_corners=False) along one spatial axis."""
    scale = in_size / out_size
    i = np.arange(out_size, dtype=np.float64)
    src = np.maximum((i + 0.5) * scale - 0.5, 0.0)
    i0 = np.minimum(np.floor(src).astype(np.int64), in_size - 1)
    i1 = np.minimum(i0 + 1, in_size - 1)
    w1 = src - i0
    w0 = 1.0 - w1
    M = np.zeros((out_size, in_size), dtype=np.float32)
    M[np.arange(out_size), i0] += w0
    M[np.arange(out_size), i1] += w1
    return M


def _rows_per_tile(H, W, target_pixels):
    """Rows per spatial tile: divides H, rows*W ~ target, and the resulting
    block shapes satisfy the (8,128) divisibility rule."""
    cap = max(1, target_pixels // max(W, 1))
    r = min(H, cap)
    while r >= 1:
        if H % r == 0 and (r == H or r % 8 == 0):
            return r
        r -= 1
    return H


# ----------------------------------------------------------------------------
# Pallas kernels
# ----------------------------------------------------------------------------
def _attn_map_kernel(xp_ref, phi_ref, wth_ref, wpsi_ref, bpsi_ref, sig_ref):
    """theta conv (patch matmul) + precomputed phi_up + ReLU + psi + sigmoid.
    Output is the LOW-RES attention map, stored lane-dense [rt, Wt]."""
    rt, Wt = sig_ref.shape[1], sig_ref.shape[2]
    # theta(x): 2x2/stride-2 conv as patch matmul -> [TPt, Cx] (f32 accumulate)
    theta = jnp.dot(xp_ref[0], wth_ref[...], preferred_element_type=jnp.float32)
    f = jnp.maximum(theta + phi_ref[0].astype(jnp.float32), 0.0)      # ReLU
    Cx = f.shape[-1]
    # psi(f): 1-output-channel 1x1 conv as VPU multiply + lane reduce; the
    # [rt, Wt, Cx] view keeps Cx in lanes so the reduce lands lane-dense.
    f3 = f.reshape(rt, Wt, Cx)
    logits = jnp.sum(f3 * wpsi_ref[...], axis=-1) + bpsi_ref[0, 0]    # [rt, Wt]
    sig_ref[0] = jax.nn.sigmoid(logits)


def _gate_apply_kernel(sig2_ref, x_ref, rh2_ref, rw2t_ref, wW_ref,
                       sigup_ref, wy_ref, sum_ref, ssq_ref):
    """Separable full-res upsample of the sigmoid map, gating, W conv, and
    per-tile BatchNorm partial sums (no cross-step accumulation)."""
    rpt, W, Cx = x_ref.shape[1], x_ref.shape[2], x_ref.shape[3]
    sig2 = sig2_ref[0]                                                # [Ht, Wt]

    # sig_up rows for this tile: Rh2_tile @ sig @ Rw2.T  -> [rpt, W]
    up_h = jnp.dot(rh2_ref[...], sig2, preferred_element_type=jnp.float32)
    sig_rows = jnp.dot(up_h, rw2t_ref[...], preferred_element_type=jnp.float32)
    sigup_ref[0] = sig_rows                                           # lane-dense map

    # Gate the input by reusing sig_rows (tiny relayout of rpt*W values only).
    y3 = sig_rows[:, :, None] * x_ref[0].astype(jnp.float32)          # [rpt, W, Cx]
    y2 = y3.reshape(rpt * W, Cx).astype(wW_ref.dtype)
    # W conv (bias-free: b_W is cancelled exactly by the following BatchNorm).
    wy = jnp.dot(y2, wW_ref[...], preferred_element_type=jnp.float32)  # [TP, Cx]
    wy_ref[0] = wy.reshape(rpt, W, Cx).astype(wy_ref.dtype)

    # Per-tile BN partial sums of the (zero-mean-ish) bias-free conv output.
    sum_ref[0, 0] = jnp.sum(wy, axis=0, keepdims=True)
    ssq_ref[0, 0] = jnp.sum(wy * wy, axis=0, keepdims=True)


# ----------------------------------------------------------------------------
# Wrapper
# ----------------------------------------------------------------------------
def add_attn_forward(x, g, params, compute_dtype=jnp.bfloat16):
    B, Cx, H, W = x.shape
    _, Cg, Hg, Wg = g.shape
    Ht, Wt = H // 2, W // 2
    f32 = jnp.float32

    # --- bilinear interpolation constants (PyTorch align_corners=False) ---
    Rh1 = jnp.asarray(bilinear_matrix(Ht, Hg))
    Rw1 = jnp.asarray(bilinear_matrix(Wt, Wg))
    Rh2 = jnp.asarray(bilinear_matrix(H, Ht))                  # [H, Ht]
    Rw2T = jnp.asarray(bilinear_matrix(W, Wt).T)               # [Wt, W]

    # --- parameter reshapes (glue) ---
    wth_mat = jnp.transpose(params['w_theta'], (1, 2, 3, 0)) \
                 .reshape(Cx * 4, Cx).astype(compute_dtype)
    wpsi_row = params['w_psi'].reshape(1, Cx).astype(f32)      # VPU reduce path
    bpsi = params['b_psi'].reshape(1, 1).astype(f32)           # SMEM scalar
    wW_mat = params['w_W'].T.astype(compute_dtype)             # [Cx, Cx]
    # NOTE: b_W is not used: the training-mode BatchNorm right after the W conv
    # subtracts the batch mean, which shifts by exactly b_W -> it cancels.

    # --- phi path precomputed in XLA (g is low-res, this is tiny) ---
    phi = jnp.einsum('bchw,oc->bhwo', g, params['w_phi']) + params['b_phi']
    phi_up = jnp.einsum('th,sw,bhwc->btsc', Rh1, Rw1, phi)     # [B, Ht, Wt, Cx]
    phi_up = phi_up.reshape(B, Ht * Wt, Cx).astype(compute_dtype)

    # --- input layouts (glue) ---
    # TODO(synk): xp and x_nhwc are two separate host relayouts of x; deriving
    # the 2x2 patch layout inside kernel 1 from x_nhwc (strided sublane loads)
    # would save one full HBM pass over x.
    xp = x.reshape(B, Cx, Ht, 2, Wt, 2).transpose(0, 2, 4, 1, 3, 5) \
          .reshape(B, Ht * Wt, Cx * 4).astype(compute_dtype)   # 2x2 stride-2 patches
    x_nhwc = x.transpose(0, 2, 3, 1).astype(compute_dtype)     # [B, H, W, Cx]

    vmem_limit = 32 * 1024 * 1024   # raises v5e's 16 MiB default; v6e/v7x-safe

    # --- kernel 1: theta conv + phi_up + relu + psi + sigmoid (low-res map) ---
    rt = _rows_per_tile(Ht, Wt, target_pixels=4096)            # theta-grid rows/tile
    TPt = rt * Wt
    PTt = Ht // rt
    sig2d = pl.pallas_call(
        _attn_map_kernel,
        out_shape=jax.ShapeDtypeStruct((B, Ht, Wt), f32),
        grid=(B, PTt),
        in_specs=[
            pl.BlockSpec((1, TPt, Cx * 4), lambda b, p: (b, p, 0)),
            pl.BlockSpec((1, TPt, Cx), lambda b, p: (b, p, 0)),
            pl.BlockSpec((Cx * 4, Cx), lambda b, p: (0, 0)),
            pl.BlockSpec((1, Cx), lambda b, p: (0, 0)),
            pl.BlockSpec(memory_space=pltpu.MemorySpace.SMEM),
        ],
        out_specs=pl.BlockSpec((1, rt, Wt), lambda b, p: (b, p, 0)),
        compiler_params=pltpu.CompilerParams(
            dimension_semantics=("parallel", "parallel"),
            vmem_limit_bytes=vmem_limit),
    )(xp, phi_up, wth_mat, wpsi_row, bpsi)

    # --- kernel 2 (fused): upsample + gate + W conv + BN partial sums ---
    rpt = _rows_per_tile(H, W, target_pixels=8192)             # image rows/tile
    PT = H // rpt
    sig_up, wy, psum, pssq = pl.pallas_call(
        _gate_apply_kernel,
        out_shape=(
            jax.ShapeDtypeStruct((B, H, W), f32),              # lane-dense map
            jax.ShapeDtypeStruct((B, H, W, Cx), compute_dtype),
            jax.ShapeDtypeStruct((B, PT, 1, Cx), f32),
            jax.ShapeDtypeStruct((B, PT, 1, Cx), f32),
        ),
        grid=(B, PT),
        in_specs=[
            pl.BlockSpec((1, Ht, Wt), lambda b, p: (b, 0, 0)),
            pl.BlockSpec((1, rpt, W, Cx), lambda b, p: (b, p, 0, 0)),
            pl.BlockSpec((rpt, Ht), lambda b, p: (p, 0)),
            pl.BlockSpec((Wt, W), lambda b, p: (0, 0)),
            pl.BlockSpec((Cx, Cx), lambda b, p: (0, 0)),
        ],
        out_specs=(
            pl.BlockSpec((1, rpt, W), lambda b, p: (b, p, 0)),
            pl.BlockSpec((1, rpt, W, Cx), lambda b, p: (b, p, 0, 0)),
            pl.BlockSpec((1, 1, 1, Cx), lambda b, p: (b, p, 0, 0)),
            pl.BlockSpec((1, 1, 1, Cx), lambda b, p: (b, p, 0, 0)),
        ),
        compiler_params=pltpu.CompilerParams(
            dimension_semantics=("parallel", "parallel"),
            vmem_limit_bytes=vmem_limit),
    )(sig2d, x_nhwc, Rh2, Rw2T, wW_mat)

    # --- BatchNorm statistics combined in XLA; scale/shift folded into the
    #     final NCHW transpose so wy is never re-read by a kernel. ---
    n = B * H * W
    mean_c = jnp.sum(psum, axis=(0, 1, 2)) / n                 # mean of (wy - b_W)
    var = jnp.maximum(jnp.sum(pssq, axis=(0, 1, 2)) / n - mean_c ** 2, 0.0)
    inv_std = 1.0 / jnp.sqrt(var + 1e-5)
    scale = params['gamma'] * inv_std                          # [Cx]
    shift = params['beta'] - mean_c * scale                    # [Cx] (b_W cancels)

    W_y = (wy.astype(f32) * scale + shift).transpose(0, 3, 1, 2)
    sigm_psi_f = sig_up[:, None, :, :]
    return W_y, sigm_psi_f


# ----------------------------------------------------------------------------
# Pure-JAX reference (NCHW, einsum-based) for correctness check
# ----------------------------------------------------------------------------
def reference_forward(x, g, params):
    B, Cx, H, W = x.shape
    _, Cg, Hg, Wg = g.shape
    Ht, Wt = H // 2, W // 2
    wth4 = jnp.transpose(params['w_theta'], (1, 2, 3, 0))          # cin,kh,kw,cout
    xp = x.reshape(B, Cx, Ht, 2, Wt, 2)
    theta = jnp.einsum('bcikjl,cklo->boij', xp, wth4)
    phi = jnp.einsum('bchw,oc->bohw', g, params['w_phi']) \
        + params['b_phi'][None, :, None, None]
    Rh1, Rw1 = map(jnp.asarray, (bilinear_matrix(Ht, Hg), bilinear_matrix(Wt, Wg)))
    phi_up = jnp.einsum('th,sw,bchw->bcts', Rh1, Rw1, phi)
    f = jnp.maximum(theta + phi_up, 0.0)
    psi = jnp.einsum('bcts,oc->bots', f, params['w_psi']) + params['b_psi'][0]
    sig = 1.0 / (1.0 + jnp.exp(-psi))
    Rh2, Rw2 = map(jnp.asarray, (bilinear_matrix(H, Ht), bilinear_matrix(W, Wt)))
    sig_up = jnp.einsum('ht,ws,bcts->bchw', Rh2, Rw2, sig)
    y = sig_up * x
    wy = jnp.einsum('bchw,oc->bohw', y, params['w_W']) \
        + params['b_W'][None, :, None, None]
    mean = jnp.mean(wy, axis=(0, 2, 3))
    var = jnp.mean((wy - mean[None, :, None, None]) ** 2, axis=(0, 2, 3))
    wy_bn = (wy - mean[None, :, None, None]) / jnp.sqrt(var + 1e-5)[None, :, None, None]
    wy_bn = wy_bn * params['gamma'][None, :, None, None] \
        + params['beta'][None, :, None, None]
    return wy_bn, sig_up


# ----------------------------------------------------------------------------
if __name__ == "__main__":
    B, Cx, H, W = 2, 8, 16, 16       # x: [B, x_channels, H, W]
    Cg, Hg, Wg = 16, 4, 4            # g: [B, g_channels, Hg, Wg]

    key = jax.random.PRNGKey(0)
    ks = jax.random.split(key, 9)
    params = {
        'w_theta': 0.1 * jax.random.normal(ks[0], (Cx, Cx, 2, 2), jnp.float32),
        'w_phi':   0.1 * jax.random.normal(ks[1], (Cx, Cg), jnp.float32),
        'b_phi':   0.1 * jax.random.normal(ks[2], (Cx,), jnp.float32),
        'w_psi':   0.1 * jax.random.normal(ks[3], (1, Cx), jnp.float32),
        'b_psi':   0.1 * jax.random.normal(ks[4], (1,), jnp.float32),
        'w_W':     0.1 * jax.random.normal(ks[5], (Cx, Cx), jnp.float32),
        'b_W':     0.1 * jax.random.normal(ks[6], (Cx,), jnp.float32),
        'gamma':   jnp.ones((Cx,), jnp.float32),   # BatchNorm2d default init
        'beta':    jnp.zeros((Cx,), jnp.float32),
    }
    x = jax.random.normal(ks[7], (B, Cx, H, W), jnp.float32)
    g = jax.random.normal(ks[8], (B, Cg, Hg, Wg), jnp.float32)

    W_y_ref, sig_ref = reference_forward(x, g, params)

    # Strict check: f32 MXU path.
    W_y, sigm_psi_f = add_attn_forward(x, g, params, compute_dtype=jnp.float32)
    jax.block_until_ready((W_y, sigm_psi_f))
    assert W_y.shape == (B, Cx, H, W)
    assert sigm_psi_f.shape == (B, 1, H, W)
    assert jnp.allclose(W_y, W_y_ref, atol=1e-4, rtol=1e-3)
    assert jnp.allclose(sigm_psi_f, sig_ref, atol=1e-5, rtol=1e-3)

    # Perf path (v6e/v7x): bf16 MXU operands, f32 accumulation — loose check.
    W_y_bf, sig_bf = add_attn_forward(x, g, params, compute_dtype=jnp.bfloat16)
    jax.block_until_ready((W_y_bf, sig_bf))
    assert jnp.allclose(W_y_bf, W_y_ref, atol=1e-1, rtol=5e-2)
    assert jnp.allclose(sig_bf, sig_ref, atol=1e-2, rtol=1e-2)

    print("KERNEL_OK")
</pallas_src>

<mosaic_0001>
module attributes {stable_mosaic.version = 11 : i64} {
  func.func @_attn_map_kernel(%arg0: i32, %arg1: i32, %arg2: memref<1x64x32xf32, #tpu.memory_space<vmem>>, %arg3: memref<1x64x8xf32, #tpu.memory_space<vmem>>, %arg4: memref<32x8xf32, #tpu.memory_space<vmem>>, %arg5: memref<1x8xf32, #tpu.memory_space<vmem>>, %arg6: memref<1x1xf32, #tpu.memory_space<smem>>, %arg7: memref<1x8x8xf32, #tpu.memory_space<vmem>>) attributes {dimension_semantics = [#tpu.dimension_semantics<parallel>, #tpu.dimension_semantics<parallel>], iteration_bounds = array<i64: 2, 1>, scalar_prefetch = 0 : i64, scratch_operands = 0 : i64, tpu.core_type = #tpu.core_type<tc>, window_params = [{transform_indices = @transform_0, window_bounds = array<i64: 1, 64, 32>}, {transform_indices = @transform_1, window_bounds = array<i64: 1, 64, 8>}, {pipeline_mode = #tpu.pipeline_mode<synchronous>, transform_indices = @transform_2, window_bounds = array<i64: 32, 8>}, {pipeline_mode = #tpu.pipeline_mode<synchronous>, transform_indices = @transform_3, window_bounds = array<i64: 1, 8>}, {transform_indices = @transform_4, window_bounds = array<i64: 1, 1>}, {transform_indices = @transform_5, window_bounds = array<i64: 1, 8, 8>}]} {
    %c0 = arith.constant 0 : index
    %c0_0 = arith.constant 0 : index
    %c0_1 = arith.constant 0 : index
    %0 = vector.load %arg2[%c0, %c0_0, %c0_1] : memref<1x64x32xf32, #tpu.memory_space<vmem>>, vector<1x64x32xf32>
    %1 = vector.shape_cast %0 : vector<1x64x32xf32> to vector<64x32xf32>
    %c0_2 = arith.constant 0 : index
    %c0_3 = arith.constant 0 : index
    %2 = vector.load %arg4[%c0_2, %c0_3] : memref<32x8xf32, #tpu.memory_space<vmem>>, vector<32x8xf32>
    %cst = arith.constant dense<0.000000e+00> : vector<64x8xf32>
    %3 = tpu.matmul %1, %2, %cst {dimension_numbers = #tpu.dot_dimension_numbers<[1], [0], [0], [1], [0, 0, 1, 1], [], []>} : vector<64x32xf32>, vector<32x8xf32>, vector<64x8xf32> -> vector<64x8xf32>
    %c0_4 = arith.constant 0 : index
    %c0_5 = arith.constant 0 : index
    %c0_6 = arith.constant 0 : index
    %4 = vector.load %arg3[%c0_4, %c0_5, %c0_6] : memref<1x64x8xf32, #tpu.memory_space<vmem>>, vector<1x64x8xf32>
    %5 = vector.shape_cast %4 : vector<1x64x8xf32> to vector<64x8xf32>
    %6 = arith.addf %3, %5 : vector<64x8xf32>
    %cst_7 = arith.constant 0.000000e+00 : f32
    %7 = vector.broadcast %cst_7 : f32 to vector<64x8xf32>
    %8 = arith.maximumf %6, %7 : vector<64x8xf32>
    %9 = vector.shape_cast %8 : vector<64x8xf32> to vector<8x8x8xf32>
    %c0_8 = arith.constant 0 : index
    %c0_9 = arith.constant 0 : index
    %10 = vector.load %arg5[%c0_8, %c0_9] : memref<1x8xf32, #tpu.memory_space<vmem>>, vector<1x8xf32>
    %11 = vector.shape_cast %10 : vector<1x8xf32> to vector<1x1x8xf32>
    %12 = vector.broadcast %11 : vector<1x1x8xf32> to vector<8x8x8xf32>
    %13 = arith.mulf %9, %12 : vector<8x8x8xf32>
    %cst_10 = arith.constant dense<0.000000e+00> : vector<8x8xf32>
    %14 = vector.multi_reduction <add>, %13, %cst_10 [2] : vector<8x8x8xf32> to vector<8x8xf32>
    %c0_11 = arith.constant 0 : index
    %c0_12 = arith.constant 0 : index
    %15 = memref.load %arg6[%c0_11, %c0_12] : memref<1x1xf32, #tpu.memory_space<smem>>
    %16 = vector.broadcast %15 : f32 to vector<8x8xf32>
    %17 = arith.addf %14, %16 : vector<8x8xf32>
    %18 = arith.negf %17 : vector<8x8xf32>
    %19 = math.exp %18 : vector<8x8xf32>
    %cst_13 = arith.constant 1.000000e+00 : f32
    %20 = vector.broadcast %cst_13 : f32 to vector<8x8xf32>
    %21 = arith.addf %20, %19 : vector<8x8xf32>
    %22 = arith.divf %20, %21 : vector<8x8xf32>
    %c0_14 = arith.constant 0 : index
    %c0_15 = arith.constant 0 : index
    %c0_16 = arith.constant 0 : index
    %23 = vector.load %arg7[%c0_14, %c0_15, %c0_16] : memref<1x8x8xf32, #tpu.memory_space<vmem>>, vector<1x8x8xf32>
    %24 = vector.shape_cast %23 : vector<1x8x8xf32> to vector<8x8xf32>
    %25 = vector.shape_cast %22 : vector<8x8xf32> to vector<1x8x8xf32>
    tpu.vector_store %arg7[%c0_14, %c0_15, %c0_16], %25 {strides = array<i32>} : memref<1x8x8xf32, #tpu.memory_space<vmem>>, vector<1x8x8xf32>,
    return
  }
  func.func @transform_0(%arg0: i32, %arg1: i32) -> (i32, i32, i32) {
    %c0_i32 = arith.constant 0 : i32
    %c0_i32_0 = arith.constant 0 : i32
    return %arg0, %arg1, %c0_i32 : i32, i32, i32
  }
  func.func @transform_1(%arg0: i32, %arg1: i32) -> (i32, i32, i32) {
    %c0_i32 = arith.constant 0 : i32
    %c0_i32_0 = arith.constant 0 : i32
    return %arg0, %arg1, %c0_i32 : i32, i32, i32
  }
  func.func @transform_2(%arg0: i32, %arg1: i32) -> (i32, i32) {
    %c0_i32 = arith.constant 0 : i32
    %c0_i32_0 = arith.constant 0 : i32
    %c0_i32_1 = arith.constant 0 : i32
    return %c0_i32, %c0_i32_0 : i32, i32
  }
  func.func @transform_3(%arg0: i32, %arg1: i32) -> (i32, i32) {
    %c0_i32 = arith.constant 0 : i32
    %c0_i32_0 = arith.constant 0 : i32
    %c0_i32_1 = arith.constant 0 : i32
    return %c0_i32, %c0_i32_0 : i32, i32
  }
  func.func @transform_4(%arg0: i32, %arg1: i32) -> (i32, i32) {
    %c0_i32 = arith.constant 0 : i32
    %c0_i32_0 = arith.constant 0 : i32
    %c0_i32_1 = arith.constant 0 : i32
    return %c0_i32, %c0_i32_0 : i32, i32
  }
  func.func @transform_5(%arg0: i32, %arg1: i32) -> (i32, i32, i32) {
    %c0_i32 = arith.constant 0 : i32
    %c0_i32_0 = arith.constant 0 : i32
    return %arg0, %arg1, %c0_i32 : i32, i32, i32
  }
}

</mosaic_0001>

<bundles_post_ra>
// kernel: tpu_custom_call.1
= control target key start
LH: loop header
LB: loop body
LE: loop exit
PB: predicated region body
PF: predicated region fallthrough
CT: control target
= control target key end

     0   :  { %s1143_s0 = inlined_call_operand.vmem [shape: f32[2,64,32], index: 0, kind: input, shape index: {}]   ;;  %s1144_s1 = inlined_call_operand.vmem [shape: f32[2,64,8], index: 1, kind: input, shape index: {}]   ;;  %s1145_s2 = inlined_call_operand.vmem [shape: f32[32,8], index: 2, kind: input, shape index: {}]   ;;  %s1146_s3 = inlined_call_operand.vmem [shape: f32[1,8], index: 3, kind: input, shape index: {}]   ;;  %s1147_s4 = inlined_call_operand.<no memory space> [shape: f32[1,1], index: 4, kind: input, shape index: {}]   ;;  %s1148_s5 = inlined_call_operand.hbm [shape: f32[2,8,8], index: 5, kind: output, shape index: {}]  }
   0x1   :  { %10 = sst [smem:[#allocation2]] %s1147_s4 }
   0x2   :  { %11 = vsyncpa [#allocation4], 0 }
   0x3   :  { %13 = vsyncpa [#allocation4 + $0x1], 0  ;;  %s989_s20 = smov 0   ;;  %s991_s21 = smov 0  }
   0x4   :  { %s993_s22 = smov 0   ;;  %s995_s23 = smov 0  }
   0x5   :  { %s997_s24 = smov 0   ;;  %s999_s25 = smov 0  }
   0x6 LB: > { %s711_s4 = sadd.s32 4294967295, %s953_s25   ;;  %s712_s26 = sadd.s32 4294967294, %s953_s25   ;;  %s953_s25 = sphi %s999_s25, %s19_s25   ;;  %s949_s24 = sphi %s997_s24, %s1155_s24   ;;  %s945_s23 = sphi %s995_s23, %s1154_s23   ;;  %s941_s22 = sphi %s993_s22, %s1153_s22   ;;  %s937_s21 = sphi %s991_s21, %s1152_s21   ;;  %s933_s20 = sphi %s989_s20, %s1151_s20  }
   0x7   : > { %s31_s27 = sadd.s32 1, %s949_s24  ;;  %s159_s28 = sadd.s32 1, %s941_s22 }
   0x8   : > { %p33_p0 = scmp.ge.s32.totalorder %s31_s27, 2  ;;  %p169_p1 = scmp.ne.s32.totalorder %s941_s22, %s937_s21 }
   0x9   : > { %p170_p2 = scmp.eq.s32.totalorder %s711_s4, 1  ;;  %p175_p3 = scmp.ne.s32.totalorder %s937_s21, %s933_s20 }
   0xa   : > { %s1157_s27 = smov (%p33_p0, %s31_s27), 0  ;;  %p176_p5 = scmp.eq.s32.totalorder %s712_s26, 1 }
   0xb   : > { %p1029_p4 = por %p170_p2, %p169_p1  ;;  %s154_s30 = ssub.s32 %s949_s24, %s1157_s27 }
   0xc   : > { %p715_p6 = scmp.ge.s32.totalorder %s953_s25, 1  ;;  %p157_p7 = scmp.eq.s32.totalorder %s154_s30, 0 }
   0xd   : > { %p1036_p8 = por %p176_p5, %p175_p3  ;;  %p229_p9 = scmp.lt.s32.totalorder %s953_s25, 3 }
   0xe   : > { %s1042_s7 = scalar_select %p157_p7, %s941_s22, %s159_s28  }
   0xf   : > { %p230_p10 = pnand %p715_p6, %p229_p9 }
  0x10   : > { %v298_v0 = vld [vmem:[%s1145_s2] sm:$0xff] (!%p230_p10)  ;;  %v299_v1 = vld [vmem:[%s1145_s2 + $0x8] sm:$0xff] (!%p230_p10)  ;;  %v300_v2 = vld [vmem:[%s1145_s2 + $0x10] sm:$0xff] (!%p230_p10)  ;;  %p271_p11 = scmp.lt.s32.totalorder (!%p230_p10), %s945_s23, 1  ;;  %vm310_vm0 = vcmask (!%p230_p10), 261120   ;;  %vm463_vm1 = vcmask (!%p230_p10), 64512  }
  0x11   : > { %233 = sbr.rel (%p230_p10) target bundleno = 452 (0x1c4), region = 40  ;;  %v776_v3 = vpack.c.bf16 (!%p230_p10), %v299_v1, %v298_v0  ;;  %v301_v4 = vld [vmem:[%s1145_s2 + $0x18] sm:$0xff] (!%p230_p10)  ;;  %v729_v26 = vld [vmem:[%s1146_s3] ss:$0 sm:$0xff] (!%p230_p10)  ;;  %s488_s10 = sld [smem:[#allocation2]] (!%p230_p10)  ;;  %vm588_vm2 = vcmask (!%p230_p10), 1041409  }
  0x12   : > { %v780_v5 = vpack.c.bf16 (!%p230_p10), %v301_v4, %v300_v2  ;;  %s267_s11 = sand.u32 (!%p230_p10), 1, %s937_s21   ;;  %vm590_vm3 = vcmask (!%p230_p10), 1042434   ;;  %vm592_vm4 = vcmask (!%p230_p10), 1043459   ;;  %vm594_vm5 = vcmask (!%p230_p10), 1044484   ;;  %s739_s13 = sshll.u32 (!%p230_p10), %s945_s23, 7 }
  0x13   : > { %777 = vmatprep.subr.bf16.mxu0 (!%p230_p10), %v776_v3  ;;  %784 = vmatprep.subr.bf16.mxu1 (!%p230_p10), %v776_v3  ;;  %s716_s12 = sshll.u32 (!%p230_p10), %s267_s11, 3  ;;  %vm596_vm6 = vcmask (!%p230_p10), 1045509   ;;  %vm598_vm7 = vcmask (!%p230_p10), 1046534   ;;  %vm600_vm8 = vcmask (!%p230_p10), 1047559   ;;  %s1093_s18 = scalar_lea.hbm (!%p230_p10), %s1148_s5, %s739_s13 }
  0x14   : > { %779 = vmatpush3.bf16.msra.mxu0 (!%p230_p10), %v776_v3  ;;  %786 = vmatpush3.bf16.msra.mxu1 (!%p230_p10), %v776_v3  ;;  %s269_s14 = scalar_lea.vmem (!%p230_p10), [#allocation3], %s716_s12 }
  0x15   : > { %781 = vmatprep.subr.bf16.mxu0 (!%p230_p10), %v780_v5  ;;  %785 = vmatprep.subr.bf16.mxu1 (!%p230_p10), %v780_v5  ;;  %s619_s15 = sshll.u32 (!%p230_p10), %s269_s14, 4  ;;  %s1095_s15 = int_to_ptr.vmem [resolvable:$true] %s619_s15 }
  0x16   : > { %s875_s19 = scalar_lea.vmem (!%p230_p10), %s1095_s15, 128 }
  0x17   : > { %v489_v63 = vstv (!%p230_p10), %s488_s10  ;;  %p876_p12 = scmp.ne.s32.totalorder (!%p230_p10), %s1095_s15, %s875_s19 }
  0x18   : > { %s1058_s16 = scalar_select %p271_p11, %s945_s23, 1  ;;  %783 = vmatpush3.bf16.msra.mxu0 %v780_v5  ;;  %787 = vmatpush3.bf16.msra.mxu1 %v780_v5 }
  0x19   : > { %s605_s23 = scalar_lea.sflag [#allocation4], %s267_s11  ;;  %p877_p13 = pnand %p876_p12, %p1029_p4 }
  0x1a   : > { %s742_s17 = sshll.u32 %s1058_s16, 6 }
  0x1b   : > { %s278_s4 = scalar_lea.vmem %s1143_s0, %s742_s17  ;;  %s288_s30 = scalar_lea.vmem %s1144_s1, %s742_s17 }
  0x1c   : > { %v290_v6 = vld [vmem:[%s278_s4] sm:$0xff]  ;;  %v291_v8 = vld [vmem:[%s278_s4 + $0x8] sm:$0xff]  ;;  %v292_v10 = vld [vmem:[%s278_s4 + $0x10] sm:$0xff]  ;;  %p878_p0 = pneg %p877_p13 }
  0x1d   : > { %764 = vmatprep.mubr.msk.f32.mxu0 %vm310_vm0, %v290_v6  ;;  %v294_v7 = vld [vmem:[%s278_s4 + $0x20] sm:$0xff]  ;;  %v295_v9 = vld [vmem:[%s278_s4 + $0x28] sm:$0xff]  ;;  %v296_v11 = vld [vmem:[%s278_s4 + $0x30] sm:$0xff] }
  0x1e   : > { %770 = vmatprep.mubr.msk.f32.mxu1 %vm310_vm0, %v294_v7  ;;  %765 = vmatmul.mubr.msk.f32.vlgmr.msra.gmra.mrb[0].mxu0 %vm310_vm0, %v291_v8  ;;  %v293_v12 = vld [vmem:[%s278_s4 + $0x18] sm:$0xff]  ;;  %v303_v14 = vld [vmem:[%s288_s30 + $0x8] sm:$0xff]  ;;  %v302_v16 = vld [vmem:[%s288_s30] sm:$0xff] }
  0x1f   : > { %771 = vmatmul.mubr.msk.f32.vlgmr.msra.gmra.mrb[0].mxu1 %vm310_vm0, %v295_v9  ;;  %767 = vmatprep.mubr.msk.f32.mxu0 %vm310_vm0, %v292_v10  ;;  %v297_v13 = vld [vmem:[%s278_s4 + $0x38] sm:$0xff]  ;;  %v307_v15 = vld [vmem:[%s288_s30 + $0x28] sm:$0xff]  ;;  %v306_v17 = vld [vmem:[%s288_s30 + $0x20] sm:$0xff]  ;;  %s955_s4 = smov [#allocation3]  }
  0x20   : > { %773 = vmatprep.mubr.msk.f32.mxu1 %vm310_vm0, %v296_v11  ;;  %v305_v25 = vld [vmem:[%s288_s30 + $0x18] sm:$0xff]  ;;  %v304_v30 = vld [vmem:[%s288_s30 + $0x10] sm:$0xff]  ;;  %s879_s26 = sshll.u32 %s955_s4, 4  ;;  %s880_s26 = int_to_ptr.vmem [resolvable:$false] %s879_s26 }
  0x21   : > { %v309_v28 = vld [vmem:[%s288_s30 + $0x38] sm:$0xff]  ;;  %v308_v31 = vld [vmem:[%s288_s30 + $0x30] sm:$0xff]  ;;  %s881_s28 = scalar_lea.vmem %s880_s26, 256  ;;  %p882_p1 = scmp.lt.s32.totalorder %s1095_s15, %s880_s26 }
  0x22   : > { %768 = vmatmul.mubr.msk.f32.gmra.mrb[2].mxu0 %vm310_vm0, %v293_v12  ;;  %p883_p2 = scmp.lt.s32.totalorder %s881_s28, %s875_s19 }
  0x23   : > { %774 = vmatmul.mubr.msk.f32.gmra.mrb[2].mxu1 %vm310_vm0, %v297_v13 }
  0x24   : > { %p884_p3 = por %p883_p2, %p882_p1 }
  0x26   : > { %p885_p5 = pnand %p884_p3, %p878_p0 }
  0xf1   : > { %v766_v18 = vpop.f32.mrb[0].mxu0 }
  0xf2   : > { %v772_v19 = vpop.f32.mrb[0].mxu1  ;;  %v407_v20 = vadd.f32 %v766_v18, %v303_v14  ;;  %v401_v21 = vpop.f32.mrb[1].mxu0 }
  0xf3   : > { %v427_v22 = vadd.f32 %v772_v19, %v307_v15  ;;  %v421_v23 = vpop.f32.mrb[1].mxu1  ;;  %v402_v24 = vadd.f32 %v401_v21, %v302_v16 }
  0xf4   : > { %v422_v27 = vadd.f32 %v421_v23, %v306_v17  ;;  %v441_v29 = vmax.f32 %v407_v20, 0.0 }
  0xf5   : > { %v440_v32 = vmax.f32 %v402_v24, 0.0  ;;  %v769_v33 = vpop.f32.mrb[2].mxu0  ;;  %v445_v50 = vmax.f32 %v427_v22, 0.0 }
  0xf6   : > { %v775_v34 = vpop.f32.mrb[2].mxu1  ;;  %v417_v35 = vadd.f32 %v769_v33, %v305_v25  ;;  %v411_v36 = vpop.f32.mrb[3].mxu0  ;;  %v456_v37 = vmul.f32 %v729_v26, %v441_v29  ;;  %v444_v38 = vmax.f32 %v422_v27, 0.0 }
  0xf7   : > { %v437_v39 = vadd.f32 %v775_v34, %v309_v28  ;;  %v431_v40 = vpop.f32.mrb[3].mxu1  ;;  %v412_v41 = vadd.f32 %v411_v36, %v304_v30  ;;  %v455_v45 = vmul.f32 %v729_v26, %v440_v32  ;;  %v460_v58 = vmul.f32 %v729_v26, %v445_v50 }
  0xf8   : > { %v432_v42 = vadd.f32 %v431_v40, %v308_v31  ;;  %v443_v43 = vmax.f32 %v417_v35, 0.0  ;;  %v467_v44 = vsel %vm463_vm1, %v456_v37, 0.0  ;;  %v459_v49 = vmul.f32 %v729_v26, %v444_v38 }
  0xf9   : > { %v442_v46 = vmax.f32 %v412_v41, 0.0  ;;  %468 = vadd.xlane.f32.xlu0 %v467_v44  ;;  %v464_v52 = vsel %vm463_vm1, %v455_v45, 0.0  ;;  %v447_v56 = vmax.f32 %v437_v39, 0.0  ;;  %v479_v60 = vsel %vm463_vm1, %v460_v58, 0.0 }
  0xfa   : > { %v458_v47 = vmul.f32 %v729_v26, %v443_v43  ;;  %v446_v48 = vmax.f32 %v432_v42, 0.0  ;;  %v476_v54 = vsel %vm463_vm1, %v459_v49, 0.0  ;;  %v554_v32 = vlaneseq }
  0xfb   : > { %v457_v53 = vmul.f32 %v729_v26, %v442_v46  ;;  %v462_v61 = vmul.f32 %v729_v26, %v447_v56 }
  0xfc   : > { %v473_v51 = vsel %vm463_vm1, %v458_v47, 0.0  ;;  %v461_v55 = vmul.f32 %v729_v26, %v446_v48  ;;  %v555_v36 = vand.u32 127, %v554_v32  ;;  %v557_v37 = vshrl.u32 %v554_v32, 7 }
  0xfd   : > { %474 = vadd.xlane.f32.xlu1 %v473_v51  ;;  %465 = vadd.xlane.f32.xlu0 %v464_v52  ;;  %v470_v57 = vsel %vm463_vm1, %v457_v53, 0.0  ;;  %v485_v62 = vsel %vm463_vm1, %v462_v61, 0.0 }
  0xfe   : > { %v482_v59 = vsel %vm463_vm1, %v461_v55, 0.0  ;;  %v558_v43 = vsub.s32 %v555_v36, %v557_v37 }
 0x101   : > { %471 = vadd.xlane.f32.xlu1 %v470_v57  ;;  %477 = vadd.xlane.f32.xlu0 %v476_v54 }
 0x105   : > { %480 = vadd.xlane.f32.xlu1 %v479_v60  ;;  %483 = vadd.xlane.f32.xlu0 %v482_v59 }
 0x109   : > { %486 = vadd.xlane.f32.xlu1 %v485_v62 }
 0x186   : > { %v469_v0 = vpop.xlane.xlu0 %468 }
 0x187   : > { %v491_v1 = vadd.f32 %v489_v63, %v469_v0 }
 0x189   : > { %v731_v2 = vmul.f32 -1.442695, %v491_v1 }
 0x18a   : > { %v475_v3 = vpop.xlane.xlu1 %474  ;;  %v466_v4 = vpop.xlane.xlu0 %465 }
 0x18b   : > { %843 = vpow2.f32 %v731_v2  ;;  %v493_v5 = vadd.f32 %v489_v63, %v475_v3  ;;  %v490_v6 = vadd.f32 %v489_v63, %v466_v4 }
 0x18d   : > { %v733_v7 = vmul.f32 -1.442695, %v493_v5  ;;  %v730_v8 = vmul.f32 -1.442695, %v490_v6 }
 0x18e   : > { %v472_v9 = vpop.xlane.xlu1 %471  ;;  %v478_v10 = vpop.xlane.xlu0 %477 }
 0x18f   : > { %845 = vpow2.f32 %v733_v7  ;;  %v492_v11 = vadd.f32 %v489_v63, %v472_v9  ;;  %v494_v12 = vadd.f32 %v489_v63, %v478_v10 }
 0x190   : > { %847 = vpow2.f32 %v730_v8 }
 0x191   : > { %v732_v13 = vmul.f32 -1.442695, %v492_v11  ;;  %v734_v14 = vmul.f32 -1.442695, %v494_v12 }
 0x192   : > { %v481_v15 = vpop.xlane.xlu1 %480  ;;  %v484_v16 = vpop.xlane.xlu0 %483 }
 0x193   : > { %849 = vpow2.f32 %v732_v13  ;;  %v495_v17 = vadd.f32 %v489_v63, %v481_v15  ;;  %v496_v18 = vadd.f32 %v489_v63, %v484_v16 }
 0x194   : > { %851 = vpow2.f32 %v734_v14 }
 0x195   : > { %v844_v19 = vpop.eup %843  ;;  %v735_v20 = vmul.f32 -1.442695, %v495_v17  ;;  %v736_v21 = vmul.f32 -1.442695, %v496_v18 }
 0x196   : > { %v487_v22 = vpop.xlane.xlu1 %486  ;;  %v523_v24 = vadd.f32 1.0, %v844_v19 }
 0x197   : > { %853 = vpow2.f32 %v735_v20  ;;  %v497_v23 = vadd.f32 %v489_v63, %v487_v22 }
 0x198   : > { %855 = vpow2.f32 %v736_v21 }
 0x199   : > { %v846_v25 = vpop.eup %845  ;;  %v737_v26 = vmul.f32 -1.442695, %v497_v23 }
 0x19a   : > { %v848_v27 = vpop.eup %847  ;;  %v525_v28 = vadd.f32 1.0, %v846_v25 }
 0x19b   : > { %v522_v29 = vadd.f32 1.0, %v848_v27  ;;  %857 = vpow2.f32 %v737_v26 }
 0x19c   : > { %859 = vrcp.f32 %v523_v24 }
 0x19d   : > { %v850_v30 = vpop.eup %849  ;;  %861 = vrcp.f32 %v522_v29 }
 0x19e   : > { %v852_v31 = vpop.eup %851  ;;  %v524_v33 = vadd.f32 1.0, %v850_v30  ;;  %863 = vrcp.f32 %v525_v28 }
 0x19f   : > { %v526_v34 = vadd.f32 1.0, %v852_v31 }
 0x1a0   : > { %865 = vrcp.f32 %v524_v33 }
 0x1a1   : > { %v854_v35 = vpop.eup %853  ;;  %867 = vrcp.f32 %v526_v34 }
 0x1a2   : > { %v527_v38 = vadd.f32 1.0, %v854_v35  ;;  %v856_v39 = vpop.eup %855 }
 0x1a3   : > { %v528_v40 = vadd.f32 1.0, %v856_v39 }
 0x1a4   : > { %869 = vrcp.f32 %v527_v38 }
 0x1a5   : > { %v858_v41 = vpop.eup %857  ;;  %871 = vrcp.f32 %v528_v40 }
 0x1a6   : > { %v860_v42 = vpop.eup %859  ;;  %v529_v44 = vadd.f32 1.0, %v858_v41 }
 0x1a7   : > { %v862_v45 = vpop.eup %861  ;;  %v563_v49 = vrot.slane %v860_v42, %v558_v43 }
 0x1a8   : > { %v559_v46 = vrot.slane %v862_v45, %v558_v43  ;;  %873 = vrcp.f32 %v529_v44  ;;  %v864_v47 = vpop.eup %863 }
 0x1a9   : > { %v571_v52 = vrot.slane %v864_v47, %v558_v43 }
 0x1aa   : > { %v866_v48 = vpop.eup %865  ;;  %v589_v54 = vsel %vm588_vm2, %v563_v49, %v559_v46 }
 0x1ab   : > { %v868_v50 = vpop.eup %867  ;;  %v567_v51 = vrot.slane %v866_v48, %v558_v43 }
 0x1ac   : > { %v575_v53 = vrot.slane %v868_v50, %v558_v43 }
 0x1ad   : > { %v591_v55 = vsel %vm590_vm3, %v567_v51, %v589_v54 }
 0x1ae   : > { %v870_v56 = vpop.eup %869  ;;  %v593_v57 = vsel %vm592_vm4, %v571_v52, %v591_v55 }
 0x1af   : > { %v579_v58 = vrot.slane %v870_v56, %v558_v43  ;;  %v595_v59 = vsel %vm594_vm5, %v575_v53, %v593_v57  ;;  %v872_v60 = vpop.eup %871 }
 0x1b0   : > { %v583_v61 = vrot.slane %v872_v60, %v558_v43 }
 0x1b1   : > { %v597_v62 = vsel %vm596_vm6, %v579_v58, %v595_v59 }
 0x1b2   : > { %v874_v63 = vpop.eup %873  ;;  %v599_v1 = vsel %vm598_vm7, %v583_v61, %v597_v62 }
 0x1b3   : > { %v587_v0 = vrot.slane %v874_v63, %v558_v43 }
 0x1b5   : > { %v601_v2 = vsel %vm600_vm8, %v587_v0, %v599_v1 }
 0x1b6   : > { %603 = vst.msk [vmem:[%s269_s14] sm:$0xff] %vm463_vm1, %v601_v2 }
 0x1b7   : > { %888 = shalt.err (!%p885_p5)
}
 0x1b8   : > { %s889_s30 = scalar_lea.hbm %s1093_s18, 128  ;;  %s893_s10 = scalar_lea.hbm %s1148_s5, 256 }
 0x1b9   : > { %p890_p6 = scmp.ne.s32.totalorder %s1093_s18, %s889_s30  ;;  %p894_p10 = scmp.lt.u32.totalorder %s1093_s18, %s1148_s5 }
 0x1ba   : > { %p895_p11 = scmp.lt.u32.totalorder %s893_s10, %s889_s30  ;;  %p897_p13 = scmp.lt.u32.totalorder %s889_s30, %s1093_s18 }
 0x1bb   : > { %p891_p7 = pnand %p890_p6, %p1029_p4 }
 0x1bc   : > { %p896_p12 = por %p895_p11, %p894_p10 }
 0x1bd   : > { %p892_p9 = pneg %p891_p7 }
 0x1be   : > { %p898_p0 = por %p897_p13, %p896_p12 }
 0x1c0   : > { %p899_p1 = pnand %p898_p0, %p892_p9 }
 0x1c2   : > { %902 = shalt.err (!%p899_p1)
}
 0x1c3   : > { %788 = dma.vmem_to_hbm [thread:$0]  (%p1029_p4), %s1095_s15, 128, %s1093_s18, %s605_s23  }
 0x1c4 PF: > { %p794_p2 = scmp.ge.s32.totalorder %s953_s25, 2  ;;  %s631_s13 = sand.u32 1, %s933_s20  }
 0x1c5   : > { %s632_s14 = scalar_lea.sflag [#allocation4], %s631_s13 }
 0x1c6   : > { %p791_p3 = pnand %p794_p2, %p1036_p8 }
 0x1c8   : > { %928 = dma.done.wait (!%p791_p3), %s632_s14, 128  }
 0x1c9   : > { %930 = vsyncadd (!%p791_p3), %s632_s14, 4294967168  ;;  %s19_s25 = sadd.s32 1, %s953_s25   ;;  %s1151_s20 = smov %s937_s21 }
 0x1ca   : > { %p16_p5 = scmp.ge.s32.totalorder %s19_s25, 4   ;;  %s1152_s21 = smov %s941_s22 }
 0x1cb   : > { %s1153_s22 = smov %s1042_s7  ;;  %s1154_s23 = smov %s949_s24 }
 0x1cc   : > { %s1155_s24 = smov %s1157_s27  ;;  %18 = sbr.rel (!%p16_p5) target bundleno = 6 (0x6), region = 78 }
 0x1d3   :  { %637 = vsyncpa [#allocation4], 1 }
 0x1d4   :  { %639 = vsyncpa [#allocation4 + $0x1], 1 }

</bundles_post_ra>
